<compile_context>
chip_gen: v7x
topology: tpu7x:2x2x1
jax: 0.10.0
libtpu: 0.0.40
codegen_flags: <defaults>
</compile_context>

<pallas_src>
import jax
import jax.numpy as jnp
from jax.experimental import pallas as pl
from jax.experimental.pallas import tpu as pltpu


def _double_conv_kernel(x_ref, t1_ref, b1_ref, t2_ref, b2_ref, o_ref):
    """Fused 3x3 conv+ReLU -> 3x3 conv+ReLU for one batch element.

    x_ref : (1, H+2, W*Cin)         flat rows; rows 0 and H+1 are zero padding
    t1_ref: (3, W*Cin, (W+2)*Cout)  block-Toeplitz conv1 weights (one per kh tap row)
    b1_ref: (1, (W+2)*Cout)         conv1 bias tiled over W, zero on the border pixels
    t2_ref: (3, (W+2)*Cout, W*Cout) block-Toeplitz conv2 weights
    b2_ref: (1, W*Cout)             conv2 bias tiled over W
    o_ref : (1, H+2, W*Cout)        rows 1..H hold the result; rows 0/H+1 are discarded
    """
    _, Hp, _ = x_ref.shape
    H = Hp - 2
    f32 = jnp.float32

    # 0/1 row-shift matrices (built once, shared by both convs). They run on the MXU,
    # so the kh halo shifts cost no XLU/retiling work:  (S @ A)[r] == A[r - 1 + kh],
    # with rows shifted out of range becoming zero.
    row = jax.lax.broadcasted_iota(jnp.int32, (Hp, Hp), 0)
    col = jax.lax.broadcasted_iota(jnp.int32, (Hp, Hp), 1)
    s_kh0 = (col == row - 1).astype(f32)   # picks A[r-1]
    s_kh2 = (col == row + 1).astype(f32)   # picks A[r+1]

    def conv3x3_relu(a, t_ref, b_ref):
        # a: (Hp, Lin) activations, zero-padded along H. kw taps are already folded
        # into the Toeplitz contraction, so one conv is just 3 deep-K MXU dots.
        a_m1 = jnp.dot(s_kh0, a, preferred_element_type=f32)   # rows shifted: A[r-1]
        a_p1 = jnp.dot(s_kh2, a, preferred_element_type=f32)   # rows shifted: A[r+1]
        acc = jnp.dot(a_m1, t_ref[0], preferred_element_type=f32)
        acc = acc + jnp.dot(a, t_ref[1], preferred_element_type=f32)
        acc = acc + jnp.dot(a_p1, t_ref[2], preferred_element_type=f32)
        return jnp.maximum(acc + b_ref[...].astype(f32), 0.0)

    x = x_ref[0].astype(f32)                          # (Hp, W*Cin)
    y1 = conv3x3_relu(x, t1_ref, b1_ref)              # (Hp, (W+2)*Cout); W-pad already 0

    # Zero only the two H-pad rows of the intermediate (single VPU mask multiply;
    # no full-scratch zero fill, nothing persists across grid steps).
    ridx = jax.lax.broadcasted_iota(jnp.int32, (Hp, 1), 0)
    y1 = y1 * ((ridx >= 1) & (ridx <= H)).astype(f32)

    y2 = conv3x3_relu(y1, t2_ref, b2_ref)             # (Hp, W*Cout)
    o_ref[0] = y2.astype(o_ref.dtype)                 # lane-dense, fully aligned store


def _conv1_toeplitz(w_oihw, W):
    """OIHW (Cout,Cin,3,3) -> (3, W*Cin, (W+2)*Cout); folds kw taps, input unpadded,
    output row already zero-padded along W (zero border columns)."""
    c_out, c_in = w_oihw.shape[0], w_oihw.shape[1]
    w = jnp.transpose(w_oihw, (2, 3, 1, 0))                # (kh, kw, Cin, Cout)
    xin = jnp.arange(W)[:, None]                           # unpadded input column
    xout = jnp.arange(W)[None, :]                          # output column
    kw = xin - xout + 1
    valid = (kw >= 0) & (kw <= 2)
    kw = jnp.clip(kw, 0, 2)
    ts = []
    for kh in range(3):
        blk = jnp.where(valid[:, :, None, None], w[kh][kw], 0.0)   # (W, W, Cin, Cout)
        t = blk.transpose(0, 2, 1, 3).reshape(W * c_in, W * c_out)
        ts.append(jnp.pad(t, ((0, 0), (c_out, c_out))))    # zero border output pixels
    return jnp.stack(ts)


def _conv2_toeplitz(w_oihw, W):
    """OIHW (Cout,Cin2,3,3) -> (3, (W+2)*Cin2, W*Cout); input row is W-padded."""
    c_out, c_in = w_oihw.shape[0], w_oihw.shape[1]
    w = jnp.transpose(w_oihw, (2, 3, 1, 0))                # (kh, kw, Cin2, Cout)
    xin = jnp.arange(W + 2)[:, None]                       # padded input column
    xout = jnp.arange(W)[None, :]
    kw = xin - xout
    valid = (kw >= 0) & (kw <= 2)
    kw = jnp.clip(kw, 0, 2)
    ts = []
    for kh in range(3):
        blk = jnp.where(valid[:, :, None, None], w[kh][kw], 0.0)   # (W+2, W, Cin2, Cout)
        ts.append(blk.transpose(0, 2, 1, 3).reshape((W + 2) * c_in, W * c_out))
    return jnp.stack(ts)


def double_conv(x_nchw, w1, b1, w2, b2):
    """DoubleConv.forward. x_nchw: (B, Cin, H, W); weights OIHW / (Cout,) like PyTorch."""
    B, Cin, H, W = x_nchw.shape
    Cout = w1.shape[0]
    Hp = H + 2

    # NCHW -> flat rows (B, H, W*Cin), plus 2 zero pad rows along H (tiny HBM cost;
    # W-padding is folded into the Toeplitz weights so it is never materialized).
    x = jnp.transpose(x_nchw, (0, 2, 3, 1)).reshape(B, H, W * Cin)
    x = jnp.pad(x, ((0, 0), (1, 1), (0, 0)))

    t1 = _conv1_toeplitz(w1, W)                                    # (3, W*Cin, (W+2)*Cout)
    t2 = _conv2_toeplitz(w2, W)                                    # (3, (W+2)*Cout, W*Cout)
    b1r = jnp.pad(jnp.tile(b1, W), (Cout, Cout)).reshape(1, (W + 2) * Cout)
    b2r = jnp.tile(b2, W).reshape(1, W * Cout)

    out = pl.pallas_call(
        _double_conv_kernel,
        out_shape=jax.ShapeDtypeStruct((B, Hp, W * Cout), x_nchw.dtype),
        grid=(B,),
        in_specs=[
            pl.BlockSpec((1, Hp, W * Cin), lambda b: (b, 0, 0)),
            pl.BlockSpec((3, W * Cin, (W + 2) * Cout), lambda b: (0, 0, 0)),
            pl.BlockSpec((1, (W + 2) * Cout), lambda b: (0, 0)),
            pl.BlockSpec((3, (W + 2) * Cout, W * Cout), lambda b: (0, 0, 0)),
            pl.BlockSpec((1, W * Cout), lambda b: (0, 0)),
        ],
        out_specs=pl.BlockSpec((1, Hp, W * Cout), lambda b: (b, 0, 0)),
        compiler_params=pltpu.CompilerParams(
            dimension_semantics=("parallel",)),
    )(x, t1, b1r, t2, b2r)

    # Strip the two pad rows, unflatten, back to NCHW.
    out = out[:, 1:H + 1, :].reshape(B, H, W, Cout)
    return jnp.transpose(out, (0, 3, 1, 2))


def _reference_double_conv(x, w1, b1, w2, b2):
    def conv(x, w, b):
        y = jax.lax.conv_general_dilated(
            x, w, window_strides=(1, 1), padding=((1, 1), (1, 1)),
            dimension_numbers=("NCHW", "OIHW", "NCHW"))
        return jax.nn.relu(y + b[None, :, None, None])
    return conv(conv(x, w1, b1), w2, b2)


if __name__ == "__main__":
    B, C_IN, C_OUT, H, W = 2, 4, 8, 16, 16
    key = jax.random.PRNGKey(0)
    kx, kw1, kb1, kw2, kb2 = jax.random.split(key, 5)

    x = jax.random.normal(kx, (B, C_IN, H, W), jnp.float32)
    # Deterministic synthetic parameters with PyTorch shapes (OIHW weights, (Cout,) bias).
    w1 = 0.1 * jax.random.normal(kw1, (C_OUT, C_IN, 3, 3), jnp.float32)
    b1 = 0.1 * jax.random.normal(kb1, (C_OUT,), jnp.float32)
    w2 = 0.1 * jax.random.normal(kw2, (C_OUT, C_OUT, 3, 3), jnp.float32)
    b2 = 0.1 * jax.random.normal(kb2, (C_OUT,), jnp.float32)

    out = jax.block_until_ready(double_conv(x, w1, b1, w2, b2))
    ref = _reference_double_conv(x, w1, b1, w2, b2)

    assert out.shape == (B, C_OUT, H, W), out.shape
    err = float(jnp.max(jnp.abs(out - ref)))
    assert jnp.allclose(out, ref, atol=1e-4, rtol=1e-4), err
    print("KERNEL_OK")
</pallas_src>

<mosaic_0001>
module attributes {stable_mosaic.version = 11 : i64} {
  func.func @_double_conv_kernel(%arg0: i32, %arg1: memref<1x18x64xf32, #tpu.memory_space<vmem>>, %arg2: memref<3x64x144xf32, #tpu.memory_space<vmem>>, %arg3: memref<1x144xf32, #tpu.memory_space<vmem>>, %arg4: memref<3x144x128xf32, #tpu.memory_space<vmem>>, %arg5: memref<1x128xf32, #tpu.memory_space<vmem>>, %arg6: memref<1x18x128xf32, #tpu.memory_space<vmem>>) attributes {dimension_semantics = [#tpu.dimension_semantics<parallel>], iteration_bounds = array<i64: 2>, scalar_prefetch = 0 : i64, scratch_operands = 0 : i64, tpu.core_type = #tpu.core_type<tc>, window_params = [{transform_indices = @transform_0, window_bounds = array<i64: 1, 18, 64>}, {pipeline_mode = #tpu.pipeline_mode<synchronous>, transform_indices = @transform_1, window_bounds = array<i64: 3, 64, 144>}, {pipeline_mode = #tpu.pipeline_mode<synchronous>, transform_indices = @transform_2, window_bounds = array<i64: 1, 144>}, {pipeline_mode = #tpu.pipeline_mode<synchronous>, transform_indices = @transform_3, window_bounds = array<i64: 3, 144, 128>}, {pipeline_mode = #tpu.pipeline_mode<synchronous>, transform_indices = @transform_4, window_bounds = array<i64: 1, 128>}, {transform_indices = @transform_5, window_bounds = array<i64: 1, 18, 128>}]} {
    %0 = tpu.iota {dimensions = array<i32: 0>} : vector<18x18xi32>
    %1 = tpu.iota {dimensions = array<i32: 1>} : vector<18x18xi32>
    %c1_i32 = arith.constant 1 : i32
    %2 = vector.broadcast %c1_i32 : i32 to vector<18x18xi32>
    %3 = arith.subi %0, %2 : vector<18x18xi32>
    %4 = arith.cmpi eq, %1, %3 : vector<18x18xi32>
    %5 = arith.extui %4 : vector<18x18xi1> to vector<18x18xi32>
    %6 = arith.sitofp %5 : vector<18x18xi32> to vector<18x18xf32>
    %c1_i32_0 = arith.constant 1 : i32
    %7 = vector.broadcast %c1_i32_0 : i32 to vector<18x18xi32>
    %8 = arith.addi %0, %7 : vector<18x18xi32>
    %9 = arith.cmpi eq, %1, %8 : vector<18x18xi32>
    %10 = arith.extui %9 : vector<18x18xi1> to vector<18x18xi32>
    %11 = arith.sitofp %10 : vector<18x18xi32> to vector<18x18xf32>
    %c0 = arith.constant 0 : index
    %c0_1 = arith.constant 0 : index
    %c0_2 = arith.constant 0 : index
    %12 = vector.load %arg1[%c0, %c0_1, %c0_2] : memref<1x18x64xf32, #tpu.memory_space<vmem>>, vector<1x18x64xf32>
    %13 = vector.shape_cast %12 : vector<1x18x64xf32> to vector<18x64xf32>
    %cst = arith.constant dense<0.000000e+00> : vector<18x64xf32>
    %14 = tpu.matmul %6, %13, %cst {dimension_numbers = #tpu.dot_dimension_numbers<[1], [0], [0], [1], [0, 0, 1, 1], [], []>} : vector<18x18xf32>, vector<18x64xf32>, vector<18x64xf32> -> vector<18x64xf32>
    %cst_3 = arith.constant dense<0.000000e+00> : vector<18x64xf32>
    %15 = tpu.matmul %11, %13, %cst_3 {dimension_numbers = #tpu.dot_dimension_numbers<[1], [0], [0], [1], [0, 0, 1, 1], [], []>} : vector<18x18xf32>, vector<18x64xf32>, vector<18x64xf32> -> vector<18x64xf32>
    %c0_4 = arith.constant 0 : index
    %c0_5 = arith.constant 0 : index
    %c0_6 = arith.constant 0 : index
    %16 = vector.load %arg2[%c0_4, %c0_5, %c0_6] : memref<3x64x144xf32, #tpu.memory_space<vmem>>, vector<1x64x144xf32>
    %17 = vector.shape_cast %16 : vector<1x64x144xf32> to vector<64x144xf32>
    %cst_7 = arith.constant dense<0.000000e+00> : vector<18x144xf32>
    %18 = tpu.matmul %14, %17, %cst_7 {dimension_numbers = #tpu.dot_dimension_numbers<[1], [0], [0], [1], [0, 0, 1, 1], [], []>} : vector<18x64xf32>, vector<64x144xf32>, vector<18x144xf32> -> vector<18x144xf32>
    %c1 = arith.constant 1 : index
    %c0_8 = arith.constant 0 : index
    %c0_9 = arith.constant 0 : index
    %19 = vector.load %arg2[%c1, %c0_8, %c0_9] : memref<3x64x144xf32, #tpu.memory_space<vmem>>, vector<1x64x144xf32>
    %20 = vector.shape_cast %19 : vector<1x64x144xf32> to vector<64x144xf32>
    %cst_10 = arith.constant dense<0.000000e+00> : vector<18x144xf32>
    %21 = tpu.matmul %13, %20, %cst_10 {dimension_numbers = #tpu.dot_dimension_numbers<[1], [0], [0], [1], [0, 0, 1, 1], [], []>} : vector<18x64xf32>, vector<64x144xf32>, vector<18x144xf32> -> vector<18x144xf32>
    %22 = arith.addf %18, %21 : vector<18x144xf32>
    %c2 = arith.constant 2 : index
    %c0_11 = arith.constant 0 : index
    %c0_12 = arith.constant 0 : index
    %23 = vector.load %arg2[%c2, %c0_11, %c0_12] : memref<3x64x144xf32, #tpu.memory_space<vmem>>, vector<1x64x144xf32>
    %24 = vector.shape_cast %23 : vector<1x64x144xf32> to vector<64x144xf32>
    %cst_13 = arith.constant dense<0.000000e+00> : vector<18x144xf32>
    %25 = tpu.matmul %15, %24, %cst_13 {dimension_numbers = #tpu.dot_dimension_numbers<[1], [0], [0], [1], [0, 0, 1, 1], [], []>} : vector<18x64xf32>, vector<64x144xf32>, vector<18x144xf32> -> vector<18x144xf32>
    %26 = arith.addf %22, %25 : vector<18x144xf32>
    %c0_14 = arith.constant 0 : index
    %c0_15 = arith.constant 0 : index
    %27 = vector.load %arg3[%c0_14, %c0_15] : memref<1x144xf32, #tpu.memory_space<vmem>>, vector<1x144xf32>
    %28 = vector.broadcast %27 : vector<1x144xf32> to vector<18x144xf32>
    %29 = arith.addf %26, %28 : vector<18x144xf32>
    %cst_16 = arith.constant 0.000000e+00 : f32
    %30 = vector.broadcast %cst_16 : f32 to vector<18x144xf32>
    %31 = arith.maximumf %29, %30 : vector<18x144xf32>
    %32 = tpu.iota {dimensions = array<i32: 0>} : vector<18x1xi32>
    %c1_i32_17 = arith.constant 1 : i32
    %33 = vector.broadcast %c1_i32_17 : i32 to vector<18x1xi32>
    %34 = arith.cmpi sge, %32, %33 : vector<18x1xi32>
    %c16_i32 = arith.constant 16 : i32
    %35 = vector.broadcast %c16_i32 : i32 to vector<18x1xi32>
    %36 = arith.cmpi sle, %32, %35 : vector<18x1xi32>
    %37 = arith.andi %34, %36 : vector<18x1xi1>
    %38 = arith.extui %37 : vector<18x1xi1> to vector<18x1xi32>
    %39 = arith.sitofp %38 : vector<18x1xi32> to vector<18x1xf32>
    %40 = vector.broadcast %39 : vector<18x1xf32> to vector<18x144xf32>
    %41 = arith.mulf %31, %40 : vector<18x144xf32>
    %cst_18 = arith.constant dense<0.000000e+00> : vector<18x144xf32>
    %42 = tpu.matmul %6, %41, %cst_18 {dimension_numbers = #tpu.dot_dimension_numbers<[1], [0], [0], [1], [0, 0, 1, 1], [], []>} : vector<18x18xf32>, vector<18x144xf32>, vector<18x144xf32> -> vector<18x144xf32>
    %cst_19 = arith.constant dense<0.000000e+00> : vector<18x144xf32>
    %43 = tpu.matmul %11, %41, %cst_19 {dimension_numbers = #tpu.dot_dimension_numbers<[1], [0], [0], [1], [0, 0, 1, 1], [], []>} : vector<18x18xf32>, vector<18x144xf32>, vector<18x144xf32> -> vector<18x144xf32>
    %c0_20 = arith.constant 0 : index
    %c0_21 = arith.constant 0 : index
    %c0_22 = arith.constant 0 : index
    %44 = vector.load %arg4[%c0_20, %c0_21, %c0_22] : memref<3x144x128xf32, #tpu.memory_space<vmem>>, vector<1x144x128xf32>
    %45 = vector.shape_cast %44 : vector<1x144x128xf32> to vector<144x128xf32>
    %cst_23 = arith.constant dense<0.000000e+00> : vector<18x128xf32>
    %46 = tpu.matmul %42, %45, %cst_23 {dimension_numbers = #tpu.dot_dimension_numbers<[1], [0], [0], [1], [0, 0, 1, 1], [], []>} : vector<18x144xf32>, vector<144x128xf32>, vector<18x128xf32> -> vector<18x128xf32>
    %c1_24 = arith.constant 1 : index
    %c0_25 = arith.constant 0 : index
    %c0_26 = arith.constant 0 : index
    %47 = vector.load %arg4[%c1_24, %c0_25, %c0_26] : memref<3x144x128xf32, #tpu.memory_space<vmem>>, vector<1x144x128xf32>
    %48 = vector.shape_cast %47 : vector<1x144x128xf32> to vector<144x128xf32>
    %cst_27 = arith.constant dense<0.000000e+00> : vector<18x128xf32>
    %49 = tpu.matmul %41, %48, %cst_27 {dimension_numbers = #tpu.dot_dimension_numbers<[1], [0], [0], [1], [0, 0, 1, 1], [], []>} : vector<18x144xf32>, vector<144x128xf32>, vector<18x128xf32> -> vector<18x128xf32>
    %50 = arith.addf %46, %49 : vector<18x128xf32>
    %c2_28 = arith.constant 2 : index
    %c0_29 = arith.constant 0 : index
    %c0_30 = arith.constant 0 : index
    %51 = vector.load %arg4[%c2_28, %c0_29, %c0_30] : memref<3x144x128xf32, #tpu.memory_space<vmem>>, vector<1x144x128xf32>
    %52 = vector.shape_cast %51 : vector<1x144x128xf32> to vector<144x128xf32>
    %cst_31 = arith.constant dense<0.000000e+00> : vector<18x128xf32>
    %53 = tpu.matmul %43, %52, %cst_31 {dimension_numbers = #tpu.dot_dimension_numbers<[1], [0], [0], [1], [0, 0, 1, 1], [], []>} : vector<18x144xf32>, vector<144x128xf32>, vector<18x128xf32> -> vector<18x128xf32>
    %54 = arith.addf %50, %53 : vector<18x128xf32>
    %c0_32 = arith.constant 0 : index
    %c0_33 = arith.constant 0 : index
    %55 = vector.load %arg5[%c0_32, %c0_33] : memref<1x128xf32, #tpu.memory_space<vmem>>, vector<1x128xf32>
    %56 = vector.broadcast %55 : vector<1x128xf32> to vector<18x128xf32>
    %57 = arith.addf %54, %56 : vector<18x128xf32>
    %cst_34 = arith.constant 0.000000e+00 : f32
    %58 = vector.broadcast %cst_34 : f32 to vector<18x128xf32>
    %59 = arith.maximumf %57, %58 : vector<18x128xf32>
    %c0_35 = arith.constant 0 : index
    %c0_36 = arith.constant 0 : index
    %c0_37 = arith.constant 0 : index
    %60 = vector.load %arg6[%c0_35, %c0_36, %c0_37] : memref<1x18x128xf32, #tpu.memory_space<vmem>>, vector<1x18x128xf32>
    %61 = vector.shape_cast %60 : vector<1x18x128xf32> to vector<18x128xf32>
    %62 = vector.shape_cast %59 : vector<18x128xf32> to vector<1x18x128xf32>
    tpu.vector_store %arg6[%c0_35, %c0_36, %c0_37], %62 {strides = array<i32>} : memref<1x18x128xf32, #tpu.memory_space<vmem>>, vector<1x18x128xf32>,
    return
  }
  func.func @transform_0(%arg0: i32) -> (i32, i32, i32) {
    %c0_i32 = arith.constant 0 : i32
    %c0_i32_0 = arith.constant 0 : i32
    %c0_i32_1 = arith.constant 0 : i32
    return %arg0, %c0_i32, %c0_i32_0 : i32, i32, i32
  }
  func.func @transform_1(%arg0: i32) -> (i32, i32, i32) {
    %c0_i32 = arith.constant 0 : i32
    %c0_i32_0 = arith.constant 0 : i32
    %c0_i32_1 = arith.constant 0 : i32
    %c0_i32_2 = arith.constant 0 : i32
    return %c0_i32, %c0_i32_0, %c0_i32_1 : i32, i32, i32
  }
  func.func @transform_2(%arg0: i32) -> (i32, i32) {
    %c0_i32 = arith.constant 0 : i32
    %c0_i32_0 = arith.constant 0 : i32
    %c0_i32_1 = arith.constant 0 : i32
    return %c0_i32, %c0_i32_0 : i32, i32
  }
  func.func @transform_3(%arg0: i32) -> (i32, i32, i32) {
    %c0_i32 = arith.constant 0 : i32
    %c0_i32_0 = arith.constant 0 : i32
    %c0_i32_1 = arith.constant 0 : i32
    %c0_i32_2 = arith.constant 0 : i32
    return %c0_i32, %c0_i32_0, %c0_i32_1 : i32, i32, i32
  }
  func.func @transform_4(%arg0: i32) -> (i32, i32) {
    %c0_i32 = arith.constant 0 : i32
    %c0_i32_0 = arith.constant 0 : i32
    %c0_i32_1 = arith.constant 0 : i32
    return %c0_i32, %c0_i32_0 : i32, i32
  }
  func.func @transform_5(%arg0: i32) -> (i32, i32, i32) {
    %c0_i32 = arith.constant 0 : i32
    %c0_i32_0 = arith.constant 0 : i32
    %c0_i32_1 = arith.constant 0 : i32
    return %arg0, %c0_i32, %c0_i32_0 : i32, i32, i32
  }
}

</mosaic_0001>

<bundles_post_ra>
// kernel: tpu_custom_call.1
= control target key start
LH: loop header
LB: loop body
LE: loop exit
PB: predicated region body
PF: predicated region fallthrough
CT: control target
= control target key end

     0   :  { %10 = vsyncpa [#allocation3], 0  ;;  %s2132_s0 = inlined_call_operand.vmem [shape: f32[2,18,64], index: 0, kind: input, shape index: {}]   ;;  %s2133_s1 = inlined_call_operand.hbm [shape: f32[3,64,144], index: 1, kind: input, shape index: {}]   ;;  %s2134_s2 = inlined_call_operand.vmem [shape: f32[1,144], index: 2, kind: input, shape index: {}]   ;;  %s2135_s3 = inlined_call_operand.hbm [shape: f32[3,144,128], index: 3, kind: input, shape index: {}]   ;;  %s2136_s4 = inlined_call_operand.vmem [shape: f32[1,128], index: 4, kind: input, shape index: {}]   ;;  %s2137_s5 = inlined_call_operand.vmem [shape: f32[2,18,128], index: 5, kind: output, shape index: {}]  }
   0x1   :  { %11 = vsyncpa [#allocation5], 0  ;;  %s1845_s18 = smov 0  }
   0x2 LB: > { %s1806_s19 = smov [#allocation2]   ;;  %s1851_s21 = sadd.s32 4294967295, %s1804_s18   ;;  %s1804_s18 = sphi %s1845_s18, %s17_s18  }
   0x3   : > { %s170_s20 = sshll.u32 %s1806_s19, 4  ;;  %p1441_p0 = scmp.ge.s32.totalorder %s1804_s18, 1  ;;  %s171_s20 = int_to_ptr.vmem [resolvable:$true] %s170_s20 }
   0x4   : > { %p158_p1 = scmp.lt.s32.totalorder %s1804_s18, 3  ;;  %p2138_p3 = scmp.eq.s32.totalorder %s1851_s21, 0 }
   0x5   : > { %s1807_s23 = smov [#allocation4]   ;;  %s1734_s28 = scalar_lea.hbm %s2133_s1, 6144 }
   0x6   : > { %p1855_p2 = pnand %p1441_p0, %p158_p1  ;;  %s186_s24 = sshll.u32 %s1807_s23, 4  ;;  %s1868_s24 = int_to_ptr.vmem [resolvable:$true] %s186_s24 }
   0x7   : > { %p1735_p6 = scmp.ne.s32.totalorder %s2133_s1, %s1734_s28  ;;  %p1741_p10 = scmp.lt.u32.totalorder %s1734_s28, %s2133_s1 }
   0x8   : > { %s2140_s22 = scalar_select %p1855_p2, 1, 0 }
   0x9   : > { %p1706_p4 = pneg %p1855_p2 }
   0xb   : > { %p1864_p5 = pnand %p2138_p3, %p1706_p4 }
   0xd   : > { %p1736_p7 = pneg %p1864_p5 }
   0xf   : > { %p1737_p8 = pnand %p1736_p7, %p1735_p6 }
  0x11   : > { %p1738_p9 = pneg %p1737_p8 }
  0x13   : > { %p1743_p11 = pnand %p1741_p10, %p1738_p9 }
  0x15   : > { %1746 = shalt.err (!%p1743_p11)
}
  0x16   : > { %s1747_s8 = scalar_lea.vmem %s171_s20, 6144  ;;  %p1755_p1 = scmp.lt.s32.totalorder %s171_s20, %s171_s20 }
  0x17   : > { %p1748_p12 = scmp.ne.s32.totalorder %s171_s20, %s1747_s8  ;;  %p1756_p4 = scmp.lt.s32.totalorder %s1747_s8, %s1747_s8 }
  0x19   : > { %p1750_p13 = pnand %p1748_p12, %p1736_p7  ;;  %p1757_p3 = por %p1756_p4, %p1755_p1 }
  0x1b   : > { %p1751_p0 = pneg %p1750_p13 }
  0x1d   : > { %p1758_p2 = pnand %p1757_p3, %p1751_p0 }
  0x1f   : > { %1761 = shalt.err (!%p1758_p2)
}
  0x20   : > { %s1808_s9 = smov 256   ;;  %s1809_s10 = smov 16  }
  0x21   : > { %1709 = dma.hbm_to_vmem [thread:$0]  (!%p1864_p5), %s2133_s1, 6144, %s171_s20, [#allocation3], %s1808_s9, %s1808_s9, %s1809_s10  }
  0x22   : > { %s1762_s15 = scalar_lea.hbm %s2135_s3, 6912 }
  0x23   : > { %p1763_p6 = scmp.ne.s32.totalorder %s2135_s3, %s1762_s15  ;;  %p1769_p8 = scmp.lt.u32.totalorder %s1762_s15, %s2135_s3 }
  0x25   : > { %p1765_p2 = pnand %p1763_p6, %p1736_p7 }
  0x27   : > { %p1766_p3 = pneg %p1765_p2 }
  0x29   : > { %p1771_p9 = pnand %p1769_p8, %p1766_p3 }
  0x2b   : > { %1774 = shalt.err (!%p1771_p9)
}
  0x2c   : > { %s1775_s20 = scalar_lea.vmem %s1868_s24, 6912  ;;  %p1783_p13 = scmp.lt.s32.totalorder %s1868_s24, %s1868_s24 }
  0x2d   : > { %p1776_p10 = scmp.ne.s32.totalorder %s1868_s24, %s1775_s20  ;;  %p1784_p0 = scmp.lt.s32.totalorder %s1775_s20, %s1775_s20 }
  0x2f   : > { %p1778_p11 = pnand %p1776_p10, %p1736_p7  ;;  %p1785_p1 = por %p1784_p0, %p1783_p13 }
  0x31   : > { %p1779_p12 = pneg %p1778_p11 }
  0x33   : > { %p1786_p4 = pnand %p1785_p1, %p1779_p12 }
  0x35   : > { %1789 = shalt.err (!%p1786_p4)
}
  0x36   : > { %s1810_s26 = smov 128   ;;  %s1811_s27 = smov 8  }
  0x37   : > { %1712 = dma.hbm_to_vmem [thread:$0]  (!%p1864_p5), %s2135_s3, 6912, %s1868_s24, [#allocation5], %s1810_s26, %s1810_s26, %s1811_s27  }
  0x38   : > { %p2142_p6 = scmp.ne.s32.totalorder %s2140_s22, 0 }
  0x39   : > { %p2143_p7 = scmp.eq.s32.totalorder (!%p2142_p6), %s1851_s21, 0 }
  0x3a   : > { %213 = sbr.rel (%p2142_p6) target bundleno = 994 (0x3e2), region = 40 }
  0x41   : > { %1795 = dma.done.wait (%p2143_p7), [#allocation3], 6144   ;;  %p2144_p2 = pmov %p2143_p7 }
  0x43   : > { %1797 = vsyncadd (%p2144_p2), [#allocation3], 4294961152  ;;  %p2145_p3 = pmov %p2144_p2 }
  0x44   : > { %p2146_p8 = pmov %p2144_p2 }
  0x45   : > { %1799 = dma.done.wait (%p2145_p3), [#allocation5], 6912  }
  0x46   : > { %1801 = vsyncadd (%p2146_p8), [#allocation5], 4294960384  ;;  %p245_p9 = scmp.lt.s32.totalorder %s1851_s21, 1  ;;  %v255_v0 = vlaneseq  ;;  %v1812_v1 = vmov 0.0|0.0   ;;  %vm1813_vm0 = vmmov 0   ;;  %v1814_v2 = vmov 0.0  }
  0x47   : > { %1542 = vmatprep.subr.bf16.mxu0 %v1812_v1  ;;  %1545 = vmatprep.subr.bf16.mxu1 %v1812_v1  ;;  %v489_v14 = vld [vmem:[#allocation2 + $0x88] sm:$0xff]  ;;  %v491_v15 = vld [vmem:[#allocation2 + $0x98] sm:$0xff]  ;;  %vm298_vm3 = vcmask 1041408   ;;  %v488_v17 = vld [vmem:[#allocation2 + $0x80] sm:$0xff]  ;;  %vm288_vm4 = vcmask 146432   ;;  %vm504_vm9 = vcmask 523264  }
  0x48   : > { %s2148_s21 = smov (!%p245_p9, %s1851_s21), 1  ;;  %1518 = vmatprep.mubr.msk.f32.mxu0 %vm1813_vm0, %v1814_v2  ;;  %v1935_v3 = vshrl.u32 %v255_v0, 7  ;;  %1533 = vmatprep.mubr.msk.f32.mxu1 %vm1813_vm0, %v1814_v2  ;;  %v260_v4 = vand.u32 127, %v255_v0  ;;  %v490_v18 = vld [vmem:[#allocation2 + $0x90] sm:$0xff]  ;;  %v1548_v23 = vpack.c.bf16 %v491_v15, %v489_v14  ;;  %v493_v25 = vld [vmem:[#allocation2 + $0xa8] sm:$0xff]  ;;  %v495_v26 = vld [vmem:[#allocation2 + $0xb8] sm:$0xff] }
  0x49   : > { %s1697_s22 = smul.u32 24, %s2148_s21  ;;  %v1550_v24 = vpack.c.bf16 %v490_v18, %v488_v17  ;;  %v492_v27 = vld [vmem:[#allocation2 + $0xa0] sm:$0xff]  ;;  %v494_v28 = vld [vmem:[#allocation2 + $0xb0] sm:$0xff]  ;;  %v1552_v31 = vpack.c.bf16 %v495_v26, %v493_v25  ;;  %v497_v32 = vld [vmem:[#allocation2 + $0xc8] sm:$0xff]  ;;  %vm1057_vm12 = vcmask 130048  }
  0x4a   : > { %v1450_v5 = vadd.s32 4294967295, %v1935_v3  ;;  %v257_v6 = vadd.s32 8, %v1935_v3  ;;  %v273_v7 = vadd.s32 1, %v1935_v3  ;;  %v1955_v11 = vadd.s32 16, %v1935_v3  ;;  %v499_v33 = vld [vmem:[#allocation2 + $0xd8] sm:$0xff]  ;;  %v496_v35 = vld [vmem:[#allocation2 + $0xc0] sm:$0xff] }
  0x4b   : > { %s249_s30 = scalar_lea.vmem %s2132_s0, %s1697_s22  ;;  %v1554_v34 = vpack.c.bf16 %v494_v28, %v492_v27  ;;  %v498_v36 = vld [vmem:[#allocation2 + $0xd0] sm:$0xff]  ;;  %v1556_v39 = vpack.c.bf16 %v499_v33, %v497_v32  ;;  %v501_v40 = vld [vmem:[#allocation2 + $0xe8] sm:$0xff]  ;;  %v503_v41 = vld [vmem:[#allocation2 + $0xf8] sm:$0xff]  ;;  %vm827_vm10 = vcmp.ge.s32.totalorder %v1935_v3, 1  ;;  %s254_s12 = scalar_lea.vmem %s2137_s5, %s1697_s22 }
  0x4c   : > { %v1948_v8 = vld [vmem:[%s249_s30] sm:$0xff]  ;;  %v1950_v9 = vld [vmem:[%s249_s30 + $0x8] sm:$0xff]  ;;  %vm264_vm1 = vcmp.eq.s32.totalorder %v260_v4, %v1450_v5  ;;  %v1451_v12 = vadd.s32 4294967295, %v257_v6  ;;  %vm276_vm2 = vcmp.eq.s32.totalorder %v260_v4, %v273_v7  ;;  %v274_v13 = vadd.s32 1, %v257_v6  ;;  %v1958_v16 = vld [vmem:[%s249_s30 + $0x10] sm:$0x3] }
  0x4d   : > { %v1543_v10 = vpack.c.bf16 %v1950_v9, %v1948_v8  ;;  %v1962_v19 = vsel %vm264_vm1, 1.0, %v1814_v2  ;;  %v1452_v20 = vadd.s32 4294967295, %v1955_v11  ;;  %v1966_v21 = vsel %vm276_vm2, 1.0, %v1814_v2  ;;  %v500_v44 = vld [vmem:[#allocation2 + $0xe0] sm:$0xff]  ;;  %v502_v45 = vld [vmem:[#allocation2 + $0xf0] sm:$0xff]  ;;  %v472_v46 = vld [vmem:[#allocation2 + $0x8] sm:$0xff] }
  0x4e   : > { %vm265_vm5 = vcmp.eq.s32.totalorder %v260_v4, %v1451_v12  ;;  %vm277_vm6 = vcmp.eq.s32.totalorder %v260_v4, %v274_v13  ;;  %v275_v22 = vadd.s32 1, %v1955_v11  ;;  %v1558_v42 = vpack.c.bf16 %v498_v36, %v496_v35  ;;  %v474_v47 = vld [vmem:[#allocation2 + $0x18] sm:$0xff]  ;;  %v471_v50 = vld [vmem:[#allocation2] sm:$0xff]  ;;  %v473_v51 = vld [vmem:[#allocation2 + $0x10] sm:$0xff] }
  0x4f   : > { %1544 = vmatpush3.bf16.msra.mxu0 %v1543_v10  ;;  %1547 = vmatpush3.bf16.msra.mxu1 %v1543_v10  ;;  %v1980_v29 = vsel %vm265_vm5, 1.0, %v1814_v2  ;;  %v1985_v30 = vsel %vm277_vm6, 1.0, %v1814_v2  ;;  %vm266_vm7 = vcmp.eq.s32.totalorder %v260_v4, %v1452_v20  ;;  %v1560_v43 = vpack.c.bf16 %v503_v41, %v501_v40  ;;  %v476_v52 = vld [vmem:[#allocation2 + $0x28] sm:$0xff]  ;;  %v478_v53 = vld [vmem:[#allocation2 + $0x38] sm:$0xff]  ;;  %v475_v56 = vld [vmem:[#allocation2 + $0x20] sm:$0xff] }
  0x50   : > { %1516 = vmatprep.subr.mxu0 %v1814_v2  ;;  %1531 = vmatprep.subr.mxu1 %v1814_v2  ;;  %vm278_vm8 = vcmp.eq.s32.totalorder %v260_v4, %v275_v22  ;;  %v1994_v37 = vsel %vm266_vm7, 1.0, %v1814_v2  ;;  %v1562_v48 = vpack.c.bf16 %v502_v45, %v500_v44  ;;  %v1564_v49 = vpack.c.bf16 %v474_v47, %v472_v46  ;;  %v477_v57 = vld [vmem:[#allocation2 + $0x30] sm:$0xff]  ;;  %v480_v58 = vld [vmem:[#allocation2 + $0x48] sm:$0xff]  ;;  %v482_v59 = vld [vmem:[#allocation2 + $0x58] sm:$0xff] }
  0x51   : > { %v1999_v38 = vsel %vm278_vm8, 1.0, %v1814_v2  ;;  %v1566_v54 = vpack.c.bf16 %v473_v51, %v471_v50  ;;  %v1568_v55 = vpack.c.bf16 %v478_v53, %v476_v52  ;;  %v1570_v60 = vpack.c.bf16 %v477_v57, %v475_v56  ;;  %v479_v62 = vld [vmem:[#allocation2 + $0x40] sm:$0xff]  ;;  %v481_v63 = vld [vmem:[#allocation2 + $0x50] sm:$0xff]  ;;  %v484_v0 = vld [vmem:[#allocation2 + $0x68] sm:$0xff] }
  0x52   : > { %v1572_v61 = vpack.c.bf16 %v482_v59, %v480_v58  ;;  %v486_v4 = vld [vmem:[#allocation2 + $0x78] sm:$0xff]  ;;  %v1574_v5 = vpack.c.bf16 %v481_v63, %v479_v62  ;;  %v483_v7 = vld [vmem:[#allocation2 + $0x60] sm:$0xff]  ;;  %v690_v12 = vld [vmem:[#allocation2 + $0x108] sm:$0xff]  ;;  %vm832_vm11 = vcmp.le.s32.totalorder %v1955_v11, 16 }
  0x53   : > { %1517 = vmatpush3.msk.msra.mxu0 %vm298_vm3, %v1958_v16  ;;  %1532 = vmatpush3.msk.msra.mxu1 %vm298_vm3, %v1958_v16  ;;  %v1576_v6 = vpack.c.bf16 %v486_v4, %v484_v0  ;;  %v692_v13 = vld [vmem:[#allocation2 + $0x118] sm:$0xff]  ;;  %v689_v14 = vld [vmem:[#allocation2 + $0x100] sm:$0xff]  ;;  %v691_v15 = vld [vmem:[#allocation2 + $0x110] sm:$0xff] }
  0x54   : > { %1519 = vmatmul.mubr.msk.f32.vlgmr.msra.gmra.mrb[0].mxu0 %vm288_vm4, %v1962_v19  ;;  %1534 = vmatmul.mubr.msk.f32.vlgmr.msra.gmra.mrb[0].mxu1 %vm288_vm4, %v1966_v21  ;;  %v694_v17 = vld [vmem:[#allocation2 + $0x128] sm:$0xff]  ;;  %v696_v18 = vld [vmem:[#allocation2 + $0x138] sm:$0xff]  ;;  %v1582_v20 = vpack.c.bf16 %v691_v15, %v689_v14  ;;  %v699_v35 = vld [vmem:[#allocation2 + $0x150] sm:$0xff] }
  0x55   : > { %1521 = vmatprep.mubr.msk.f32.mxu0 %vm1813_vm0, %v1814_v2  ;;  %1536 = vmatprep.mubr.msk.f32.mxu1 %vm1813_vm0, %v1814_v2  ;;  %v1584_v22 = vpack.c.bf16 %v696_v18, %v694_v17  ;;  %v700_v26 = vld [vmem:[#allocation2 + $0x158] sm:$0xff]  ;;  %v701_v46 = vld [vmem:[#allocation2 + $0x160] sm:$0xff]  ;;  %v703_v47 = vld [vmem:[#allocation2 + $0x170] sm:$0xff]  ;;  %v807_v18 = vsub.s32 0, %v1935_v3 }
  0x56   : > { %1549 = vmatprep.subr.bf16.mxu0 %v1548_v23  ;;  %v693_v23 = vld [vmem:[#allocation2 + $0x120] sm:$0xff]  ;;  %v704_v40 = vld [vmem:[#allocation2 + $0x178] sm:$0xff]  ;;  %v1594_v52 = vpack.c.bf16 %v703_v47, %v701_v46  ;;  %v1026_v62 = vld [vmem:[#allocation4 + $0x30] sm:$0xff] }
  0x57   : > { %1551 = vmatpush1.bf16.msra.mxu0 %v1550_v24  ;;  %v695_v24 = vld [vmem:[#allocation2 + $0x130] sm:$0xff]  ;;  %v1020_v53 = vld [vmem:[#allocation4] sm:$0xff]  ;;  %v1023_v57 = vld [vmem:[#allocation4 + $0x18] sm:$0xff] }
  0x58   : > { %1522 = vmatmul.mubr.msk.f32.gmra.mrb[2].mxu0 %vm288_vm4, %v1980_v29  ;;  %1537 = vmatmul.mubr.msk.f32.gmra.mrb[2].mxu1 %vm288_vm4, %v1985_v30  ;;  %v1586_v32 = vpack.c.bf16 %v695_v24, %v693_v23  ;;  %v1024_v59 = vld [vmem:[#allocation4 + $0x20] sm:$0xff]  ;;  %v1027_v63 = vld [vmem:[#allocation4 + $0x38] sm:$0xff]  ;;  %v1034_v14 = vld [vmem:[#allocation4 + $0x70] sm:$0xff] }
  0x59   : > { %1524 = vmatprep.mubr.msk.f32.mxu0 %vm1813_vm0, %v1814_v2  ;;  %1539 = vmatprep.mubr.msk.f32.mxu1 %vm1813_vm0, %v1814_v2  ;;  %v1641_v0 = vpack.c.bf16 %v1027_v63, %v1026_v62  ;;  %v1028_v4 = vld [vmem:[#allocation4 + $0x40] sm:$0xff]  ;;  %v1035_v15 = vld [vmem:[#allocation4 + $0x78] sm:$0xff]  ;;  %v1039_v11 = vld [vmem:[#allocation4 + $0x90] sm:$0xff] }
  0x5a   : > { %1553 = vmatprep.subr.bf16.mxu0 %v1552_v31  ;;  %v1653_v17 = vpack.c.bf16 %v1035_v15, %v1034_v14  ;;  %v1050_v62 = vld [vmem:[#allocation4 + $0xe8] sm:$0xff]  ;;  %v1238_v15 = vld [vmem:[#allocation4 + $0x130] sm:$0xff] }
  0x5b   : > { %1555 = vmatpush1.bf16.msra.mxu0 %v1554_v34  ;;  %v697_v34 = vld [vmem:[#allocation2 + $0x140] sm:$0xff] }
  0x5c   : > { %1525 = vmatmul.mubr.msk.f32.gmra.mrb[4].mxu0 %vm288_vm4, %v1994_v37  ;;  %1540 = vmatmul.mubr.msk.f32.gmra.mrb[4].mxu1 %vm288_vm4, %v1999_v38  ;;  %v1590_v44 = vpack.c.bf16 %v699_v35, %v697_v34 }
  0x5d   : > { %1557 = vmatprep.subr.bf16.mxu0 %v1556_v39  ;;  %577 = vmatprep.mubr.f32.mxu0 %v1814_v2  ;;  %v702_v39 = vld [vmem:[#allocation2 + $0x168] sm:$0xff] }
  0x5e   : > { %918 = vmatprep.mubr.f32.mxu1 %v1814_v2  ;;  %v1592_v45 = vpack.c.bf16 %v704_v40, %v702_v39 }
  0x5f   : > { %1559 = vmatpush1.bf16.msra.mxu0 %v1558_v42 }
  0x60   : > { %1561 = vmatprep.subr.bf16.mxu0 %v1560_v43 }
  0x63   : > { %1563 = vmatpush1.bf16.msra.mxu0 %v1562_v48 }
  0x64   : > { %1565 = vmatprep.subr.bf16.mxu0 %v1564_v49 }
  0x66   : > { %1467 = vmatmul.mubr.msk.f32.vlgmr.msra.gmra.mrb[6].mxu0 %vm504_vm9, %v1948_v8  ;;  %v485_v8 = vld [vmem:[#allocation2 + $0x70] sm:$0xff] }
  0x67   : > { %1567 = vmatpush1.bf16.msra.mxu0 %v1566_v54  ;;  %583 = vmatprep.mubr.f32.mxu0 %v1814_v2  ;;  %v1578_v10 = vpack.c.bf16 %v485_v8, %v483_v7  ;;  %v1021_v54 = vld [vmem:[#allocation4 + $0x8] sm:$0xff]  ;;  %v1030_v7 = vld [vmem:[#allocation4 + $0x50] sm:$0xff]  ;;  %v1031_v8 = vld [vmem:[#allocation4 + $0x58] sm:$0xff] }
  0x68   : > { %1569 = vmatprep.subr.bf16.mxu0 %v1568_v55  ;;  %v1022_v55 = vld [vmem:[#allocation4 + $0x10] sm:$0xff]  ;;  %v1632_v56 = vpack.c.bf16 %v1021_v54, %v1020_v53  ;;  %v1040_v53 = vld [vmem:[#allocation4 + $0x98] sm:$0xff]  ;;  %v1041_v54 = vld [vmem:[#allocation4 + $0xa0] sm:$0xff] }
  0x69   : > { %v1635_v58 = vpack.c.bf16 %v1023_v57, %v1022_v55  ;;  %v1042_v55 = vld [vmem:[#allocation4 + $0xa8] sm:$0xff]  ;;  %v1044_v57 = vld [vmem:[#allocation4 + $0xb8] sm:$0xff] }
  0x6a   : > { %1468 = vmatmul.mubr.msk.f32.gmra.mrb[8].mxu0 %vm504_vm9, %v1950_v9  ;;  %v1580_v9 = vpack.c.bf16 %v692_v13, %v690_v12  ;;  %v1032_v12 = vld [vmem:[#allocation4 + $0x60] sm:$0xff]  ;;  %v1033_v13 = vld [vmem:[#allocation4 + $0x68] sm:$0xff] }
  0x6b   : > { %1571 = vmatpush1.bf16.msra.mxu0 %v1570_v60  ;;  %589 = vmatprep.mubr.f32.mxu0 %v1814_v2  ;;  %v1025_v60 = vld [vmem:[#allocation4 + $0x28] sm:$0xff] }
  0x6c   : > { %1573 = vmatprep.subr.bf16.mxu0 %v1572_v61  ;;  %v1638_v61 = vpack.c.bf16 %v1025_v60, %v1024_v59  ;;  %v1047_v60 = vld [vmem:[#allocation4 + $0xd0] sm:$0xff] }
  0x6e   : > { %1469 = vmatmul.mubr.msk.f32.gmra.mrb[10].mxu0 %vm504_vm9, %v1958_v16  ;;  %v698_v16 = vld [vmem:[#allocation2 + $0x148] sm:$0xff] }
  0x6f   : > { %1575 = vmatpush1.bf16.msra.mxu0 %v1574_v5  ;;  %669 = vmatprep.mubr.f32.mxu0 %v1814_v2  ;;  %v1588_v33 = vpack.c.bf16 %v700_v26, %v698_v16  ;;  %v1029_v5 = vld [vmem:[#allocation4 + $0x48] sm:$0xff] }
  0x70   : > { %1577 = vmatprep.subr.bf16.mxu0 %v1576_v6  ;;  %v1644_v6 = vpack.c.bf16 %v1029_v5, %v1028_v4  ;;  %v1053_v5 = vld [vmem:[#allocation4 + $0x100] sm:$0xff] }
  0x73   : > { %1579 = vmatpush1.bf16.msra.mxu0 %v1578_v10  ;;  %v1647_v10 = vpack.c.bf16 %v1031_v8, %v1030_v7  ;;  %v1055_v8 = vld [vmem:[#allocation4 + $0x110] sm:$0xff] }
  0x74   : > { %1581 = vmatprep.subr.bf16.mxu0 %v1580_v9  ;;  %v1650_v9 = vpack.c.bf16 %v1033_v13, %v1032_v12  ;;  %v1236_v13 = vld [vmem:[#allocation4 + $0x120] sm:$0xff] }
 0x127   : > { %v368_v25 = vpop.f32.mrb[0].mxu0  ;;  %v457_v27 = vpop.f32.mrb[0].mxu1 }
 0x128   : > { %v1520_v28 = vpop.f32.mrb[1].mxu0  ;;  %1470 = vmatmul.mubr.msk.f32.vlgmr.msra.gmra.mrb[6].mxu0 %vm504_vm9, %v368_v25  ;;  %v1535_v31 = vpop.f32.mrb[1].mxu1 }
 0x129   : > { %1583 = vmatpush1.bf16.msra.mxu0 %v1582_v20  ;;  %675 = vmatprep.mubr.f32.mxu0 %v1814_v2  ;;  %v803_v20 = vld [vmem:[%s2134_s2] sm:$0x3]  ;;  %v1476_v31 = vsel %vm827_vm10, 1.0, %v1814_v2 }
 0x12a   : > { %1585 = vmatprep.subr.bf16.mxu0 %v1584_v22  ;;  %v811_v22 = vsub.s32 1, %v1935_v3  ;;  %v808_v23 = vrot.slane %v803_v20, %v807_v18 }
 0x12b   : > { %v373_v36 = vpop.f32.mrb[2].mxu0  ;;  %v462_v41 = vpop.f32.mrb[2].mxu1 }
 0x12c   : > { %v1523_v42 = vpop.f32.mrb[3].mxu0  ;;  %1471 = vmatmul.mubr.msk.f32.gmra.mrb[8].mxu0 %vm504_vm9, %v373_v36  ;;  %v1538_v43 = vpop.f32.mrb[3].mxu1  ;;  %v812_v24 = vrot.slane %v803_v20, %v811_v22  ;;  %v1240_v20 = vld [vmem:[#allocation4 + $0x140] sm:$0xff]  ;;  %v1241_v22 = vld [vmem:[#allocation4 + $0x148] sm:$0xff] }
 0x12d   : > { %1587 = vmatpush1.bf16.msra.mxu0 %v1586_v32  ;;  %681 = vmatprep.mubr.f32.mxu0 %v1814_v2 }
 0x12e   : > { %1589 = vmatprep.subr.bf16.mxu0 %v1588_v33 }
 0x12f   : > { %v378_v48 = vpop.f32.mrb[4].mxu0  ;;  %v467_v49 = vpop.f32.mrb[4].mxu1 }
 0x130   : > { %v1526_v50 = vpop.f32.mrb[5].mxu0  ;;  %1472 = vmatmul.mubr.msk.f32.gmra.mrb[10].mxu0 %vm504_vm9, %v378_v48  ;;  %v1541_v51 = vpop.f32.mrb[5].mxu1 }
 0x131   : > { %1591 = vmatpush1.bf16.msra.mxu0 %v1590_v44  ;;  %778 = vmatprep.mubr.f32.mxu0 %v1814_v2 }
 0x132   : > { %1593 = vmatprep.subr.bf16.mxu0 %v1592_v45 }
 0x135   : > { %1595 = vmatpush1.bf16.msra.mxu0 %v1594_v52 }
 0x136   : > { %1631 = vmatprep.subr.bf16.mxu0 %v1812_v1 }
 0x138   : > { %1473 = vmatmul.mubr.msk.f32.vlgmr.msra.gmra.mrb[6].mxu0 %vm504_vm9, %v457_v27 }
 0x139   : > { %784 = vmatprep.mubr.f32.mxu0 %v1814_v2  ;;  %1633 = vmatpush1.bf16.msra.mxu0 %v1632_v56  ;;  %v1043_v56 = vld [vmem:[#allocation4 + $0xb0] sm:$0xff] }
 0x13a   : > { %1634 = vmatprep.subr.bf16.mxu0 %v1812_v1 }
 0x13c   : > { %1474 = vmatmul.mubr.msk.f32.gmra.mrb[8].mxu0 %vm504_vm9, %v462_v41 }
 0x13d   : > { %790 = vmatprep.mubr.f32.mxu0 %v1814_v2  ;;  %1636 = vmatpush1.bf16.msra.mxu0 %v1635_v58  ;;  %v1045_v58 = vld [vmem:[#allocation4 + $0xc0] sm:$0xff] }
 0x13e   : > { %1637 = vmatprep.subr.bf16.mxu0 %v1812_v1 }
 0x140   : > { %1475 = vmatmul.mubr.msk.f32.gmra.mrb[10].mxu0 %vm504_vm9, %v467_v49  ;;  %v1477_v49 = vsel %vm832_vm11, 1.0, %v1814_v2 }
 0x141   : > { %1639 = vmatpush1.bf16.msra.mxu0 %v1638_v61 }
 0x142   : > { %1640 = vmatprep.subr.bf16.mxu0 %v1812_v1 }
 0x145   : > { %1642 = vmatpush1.bf16.msra.mxu0 %v1641_v0  ;;  %v1051_v0 = vld [vmem:[#allocation4 + $0xf0] sm:$0xff] }
 0x146   : > { %1643 = vmatprep.subr.bf16.mxu0 %v1812_v1 }
 0x149   : > { %1645 = vmatpush1.bf16.msra.mxu0 %v1644_v6  ;;  %v1054_v6 = vld [vmem:[#allocation4 + $0x108] sm:$0xff] }
 0x14a   : > { %1646 = vmatprep.subr.bf16.mxu0 %v1812_v1  ;;  %v1626_v7 = vpack.c.bf16 %v1054_v6, %v1053_v5  ;;  %v1497_v5 = vld [vmem:[%s2136_s4] ss:$0 sm:$0xff] }
 0x14d   : > { %1648 = vmatpush1.bf16.msra.mxu0 %v1647_v10  ;;  %v1056_v10 = vld [vmem:[#allocation4 + $0x118] sm:$0xff] }
 0x14e   : > { %1649 = vmatprep.subr.bf16.mxu0 %v1812_v1  ;;  %v1629_v12 = vpack.c.bf16 %v1056_v10, %v1055_v8 }
 0x151   : > { %1651 = vmatpush1.bf16.msra.mxu0 %v1650_v9  ;;  %v1237_v9 = vld [vmem:[#allocation4 + $0x128] sm:$0xff] }
 0x152   : > { %1652 = vmatprep.subr.bf16.mxu0 %v1812_v1  ;;  %v1659_v14 = vpack.c.bf16 %v1237_v9, %v1236_v13 }
 0x155   : > { %1654 = vmatpush1.bf16.msra.mxu0 %v1653_v17  ;;  %v1239_v17 = vld [vmem:[#allocation4 + $0x138] sm:$0xff] }
 0x156   : > { %1655 = vmatprep.subr.bf16.mxu0 %v1812_v1  ;;  %v1662_v18 = vpack.c.bf16 %v1239_v17, %v1238_v15 }
 0x20b   : > { %v780_v25 = vpop.f32.mrb[6].mxu0 }
 0x20c   : > { %v815_v16 = vadd.f32 %v808_v23, %v780_v25  ;;  %v782_v26 = vpop.f32.mrb[7].mxu0  ;;  %v1243_v25 = vld [vmem:[#allocation4 + $0x158] sm:$0xff] }
 0x20d   : > { %v816_v27 = vadd.f32 %v812_v24, %v782_v26  ;;  %v1244_v26 = vld [vmem:[#allocation4 + $0x160] sm:$0xff] }
 0x20e   : > { %v821_v28 = vmax.f32 %v815_v16, 0.0 }
 0x20f   : > { %v822_v32 = vmax.f32 %v816_v27, 0.0  ;;  %v786_v33 = vpop.f32.mrb[8].mxu0  ;;  %v1245_v27 = vld [vmem:[#allocation4 + $0x168] sm:$0xff] }
 0x210   : > { %v2043_v34 = vadd.f32 %v808_v23, %v786_v33  ;;  %v788_v35 = vpop.f32.mrb[9].mxu0  ;;  %v2047_v39 = vmul.f32 %v1476_v31, %v821_v28  ;;  %v1671_v28 = vpack.c.bf16 %v1245_v27, %v1244_v26  ;;  %v1246_v33 = vld [vmem:[#allocation4 + $0x170] sm:$0xff] }
 0x211   : > { %v2045_v36 = vadd.f32 %v812_v24, %v788_v35  ;;  %v843_v41 = vmul.f32 %v1476_v31, %v822_v32  ;;  %v1036_v31 = vld [vmem:[#allocation4 + $0x80] sm:$0xff]  ;;  %v1037_v32 = vld [vmem:[#allocation4 + $0x88] sm:$0xff]  ;;  %v1247_v35 = vld [vmem:[#allocation4 + $0x178] sm:$0xff] }
 0x212   : > { %v823_v40 = vmax.f32 %v2043_v34, 0.0  ;;  %v1656_v34 = vpack.c.bf16 %v1037_v32, %v1036_v31 }
 0x213   : > { %v824_v42 = vmax.f32 %v2045_v36, 0.0  ;;  %v792_v3 = vpop.f32.mrb[10].mxu0  ;;  %v1674_v36 = vpack.c.bf16 %v1247_v35, %v1246_v33 }
 0x214   : > { %v1598_v43 = vpack.c.bf16 %v823_v40, %v2047_v39  ;;  %v819_v44 = vadd.f32 %v808_v23, %v792_v3  ;;  %v794_v45 = vpop.f32.mrb[11].mxu0  ;;  %v1665_v23 = vpack.c.bf16 %v1241_v22, %v1240_v20  ;;  %1657 = vmatpush1.bf16.msra.mxu0 %v1656_v34  ;;  %v1251_v3 = vld [vmem:[#allocation4 + $0x198] sm:$0xff] }
 0x215   : > { %v1596_v46 = vpack.c.bf16 %v824_v42, %v843_v41  ;;  %v820_v47 = vadd.f32 %v812_v24, %v794_v45  ;;  %v1242_v24 = vld [vmem:[#allocation4 + $0x150] sm:$0xff]  ;;  %v1253_v45 = vld [vmem:[#allocation4 + $0x1a8] sm:$0xff] }
 0x216   : > { %v825_v48 = vmax.f32 %v819_v44, 0.0  ;;  %v1668_v16 = vpack.c.bf16 %v1243_v25, %v1242_v24  ;;  %v1252_v44 = vld [vmem:[#allocation4 + $0x1a0] sm:$0xff] }
 0x217   : > { %v826_v50 = vmax.f32 %v820_v47, 0.0  ;;  %1597 = vmatprep.subr.bf16.mxu1 %v1596_v46 }
 0x218   : > { %1599 = vmatpush1.bf16.msra.mxu1 %v1598_v43  ;;  %v2060_v52 = vmul.f32 %v1477_v49, %v825_v48 }
 0x219   : > { %v2058_v51 = vmul.f32 %v1477_v49, %v826_v50 }
 0x21b   : > { %1478 = vmatprep.subr.msk.mxu1 %vm298_vm3, %v2058_v51 }
 0x21c   : > { %1479 = vmatpush1.msk.msra.mxu1 %vm298_vm3, %v2060_v52 }
 0x21d   : > { %1480 = vmatmul.mubr.msk.f32.vlgmr.msra.gmra.mrb[6].mxu1 %vm288_vm4, %v1962_v19  ;;  %1601 = vmatprep.subr.bf16.mxu1 %v1596_v46  ;;  %v1605_v19 = vpack.c.bf16 %v1040_v53, %v1039_v11  ;;  %v1683_v46 = vpack.c.bf16 %v1253_v45, %v1252_v44 }
 0x21e   : > { %1603 = vmatpush1.bf16.msra.mxu1 %v1598_v43  ;;  %924 = vmatprep.mubr.f32.mxu1 %v1814_v2 }
 0x21f   : > { %1483 = vmatprep.subr.msk.mxu1 %vm298_vm3, %v2058_v51 }
 0x221   : > { %1481 = vmatmul.mubr.msk.f32.gmra.mrb[8].mxu1 %vm288_vm4, %v1980_v29  ;;  %v1608_v29 = vpack.c.bf16 %v1042_v55, %v1041_v54 }
 0x222   : > { %1484 = vmatpush1.msk.msra.mxu1 %vm298_vm3, %v2060_v52  ;;  %930 = vmatprep.mubr.f32.mxu1 %v1814_v2 }
 0x223   : > { %1604 = vmatprep.subr.bf16.mxu1 %v1812_v1 }
 0x225   : > { %1482 = vmatmul.mubr.msk.f32.gmra.mrb[10].mxu1 %vm288_vm4, %v1994_v37  ;;  %v1611_v37 = vpack.c.bf16 %v1044_v57, %v1043_v56 }
 0x226   : > { %1001 = vmatprep.mubr.f32.mxu1 %v1814_v2 }
 0x229   : > { %1485 = vmatmul.mubr.msk.f32.vlgmr.msra.gmra.mrb[12].mxu1 %vm288_vm4, %v1966_v21  ;;  %v1046_v21 = vld [vmem:[#allocation4 + $0xc8] sm:$0xff] }
 0x22a   : > { %1606 = vmatpush1.bf16.msra.mxu1 %v1605_v19  ;;  %1007 = vmatprep.mubr.f32.mxu1 %v1814_v2  ;;  %v1614_v59 = vpack.c.bf16 %v1046_v21, %v1045_v58 }
 0x22b   : > { %1607 = vmatprep.subr.bf16.mxu1 %v1812_v1 }
 0x22d   : > { %1486 = vmatmul.mubr.msk.f32.gmra.mrb[14].mxu1 %vm288_vm4, %v1985_v30  ;;  %v1048_v30 = vld [vmem:[#allocation4 + $0xd8] sm:$0xff] }
 0x22e   : > { %1609 = vmatpush1.bf16.msra.mxu1 %v1608_v29  ;;  %1013 = vmatprep.mubr.f32.mxu1 %v1814_v2  ;;  %v1617_v61 = vpack.c.bf16 %v1048_v30, %v1047_v60  ;;  %v1049_v2 = vld [vmem:[#allocation4 + $0xe0] sm:$0xff] }
 0x22f   : > { %1610 = vmatprep.subr.bf16.mxu1 %v1812_v1  ;;  %v1620_v63 = vpack.c.bf16 %v1050_v62, %v1049_v2 }
 0x231   : > { %1487 = vmatmul.mubr.msk.f32.gmra.mrb[16].mxu1 %vm288_vm4, %v1999_v38  ;;  %v1052_v38 = vld [vmem:[#allocation4 + $0xf8] sm:$0xff] }
 0x232   : > { %1612 = vmatpush1.bf16.msra.mxu1 %v1611_v37  ;;  %1488 = vmatprep.mubr.msk.f32.mxu1 %vm1057_vm12, %v843_v41  ;;  %v1623_v4 = vpack.c.bf16 %v1052_v38, %v1051_v0 }
 0x233   : > { %1613 = vmatprep.subr.bf16.mxu1 %v1812_v1 }
 0x236   : > { %1615 = vmatpush1.bf16.msra.mxu1 %v1614_v59 }
 0x237   : > { %1616 = vmatprep.subr.bf16.mxu1 %v1812_v1 }
 0x23a   : > { %1618 = vmatpush1.bf16.msra.mxu1 %v1617_v61 }
 0x23b   : > { %1619 = vmatprep.subr.bf16.mxu1 %v1812_v1 }
 0x23e   : > { %1621 = vmatpush1.bf16.msra.mxu1 %v1620_v63 }
 0x23f   : > { %1622 = vmatprep.subr.bf16.mxu1 %v1812_v1 }
 0x242   : > { %1624 = vmatpush1.bf16.msra.mxu1 %v1623_v4 }
 0x243   : > { %1625 = vmatprep.subr.bf16.mxu1 %v1812_v1 }
 0x246   : > { %1627 = vmatpush1.bf16.msra.mxu1 %v1626_v7 }
 0x247   : > { %1628 = vmatprep.subr.bf16.mxu1 %v1812_v1 }
 0x24a   : > { %1630 = vmatpush1.bf16.msra.mxu1 %v1629_v12 }
 0x24b   : > { %1658 = vmatprep.subr.bf16.mxu1 %v1812_v1 }
 0x24d   : > { %1131 = vmatmul.mubr.f32.vlgmr.msra.gmra.mrb[18].mxu1 %v2047_v39  ;;  %v1248_v39 = vld [vmem:[#allocation4 + $0x180] sm:$0xff] }
 0x24e   : > { %1489 = vmatprep.mubr.msk.f32.mxu1 %vm1057_vm12, %v824_v42  ;;  %1660 = vmatpush1.bf16.msra.mxu1 %v1659_v14  ;;  %v1250_v42 = vld [vmem:[#allocation4 + $0x190] sm:$0xff] }
 0x24f   : > { %1661 = vmatprep.subr.bf16.mxu1 %v1812_v1  ;;  %v1680_v43 = vpack.c.bf16 %v1251_v3, %v1250_v42 }
 0x251   : > { %1136 = vmatmul.mubr.f32.gmra.mrb[20].mxu1 %v823_v40  ;;  %v1249_v40 = vld [vmem:[#allocation4 + $0x188] sm:$0xff] }
 0x252   : > { %1490 = vmatprep.mubr.msk.f32.mxu1 %vm1057_vm12, %v2058_v51  ;;  %1663 = vmatpush1.bf16.msra.mxu1 %v1662_v18  ;;  %v1677_v41 = vpack.c.bf16 %v1249_v40, %v1248_v39 }
 0x253   : > { %1664 = vmatprep.subr.bf16.mxu1 %v1812_v1 }
 0x255   : > { %1141 = vmatmul.mubr.f32.gmra.mrb[22].mxu1 %v2060_v52 }
 0x256   : > { %1666 = vmatpush1.bf16.msra.mxu1 %v1665_v23 }
 0x257   : > { %1667 = vmatprep.subr.bf16.mxu1 %v1812_v1 }
 0x25a   : > { %1669 = vmatpush1.bf16.msra.mxu1 %v1668_v16 }
 0x25b   : > { %1670 = vmatprep.subr.bf16.mxu1 %v1812_v1 }
 0x25e   : > { %1672 = vmatpush1.bf16.msra.mxu1 %v1671_v28 }
 0x25f   : > { %1673 = vmatprep.subr.bf16.mxu1 %v1812_v1 }
 0x262   : > { %1675 = vmatpush1.bf16.msra.mxu1 %v1674_v36 }
 0x263   : > { %1676 = vmatprep.subr.bf16.mxu1 %v1812_v1 }
 0x266   : > { %1678 = vmatpush1.bf16.msra.mxu1 %v1677_v41 }
 0x267   : > { %1679 = vmatprep.subr.bf16.mxu1 %v1812_v1 }
 0x26a   : > { %1681 = vmatpush1.bf16.msra.mxu1 %v1680_v43 }
 0x26b   : > { %1682 = vmatprep.subr.bf16.mxu1 %v1812_v1 }
 0x26e   : > { %1684 = vmatpush1.bf16.msra.mxu1 %v1683_v46 }
 0x2f0   : > { %v920_v47 = vpop.f32.mrb[6].mxu1 }
 0x2f1   : > { %v922_v48 = vpop.f32.mrb[7].mxu1 }
 0x2f2   : > { %1491 = vmatprep.mubr.msk.f32.mxu0 %vm1057_vm12, %v922_v48 }
 0x2f3   : > { %1220 = vmatmul.mubr.f32.vlgmr.msra.gmra.mrb[12].mxu0 %v920_v47 }
 0x2f4   : > { %v926_v49 = vpop.f32.mrb[8].mxu1 }
 0x2f5   : > { %v928_v50 = vpop.f32.mrb[9].mxu1 }
 0x2f6   : > { %1492 = vmatprep.mubr.msk.f32.mxu0 %vm1057_vm12, %v928_v50 }
 0x2f7   : > { %1225 = vmatmul.mubr.f32.gmra.mrb[14].mxu0 %v926_v49 }
 0x2f8   : > { %v932_v51 = vpop.f32.mrb[10].mxu1 }
 0x2f9   : > { %v934_v52 = vpop.f32.mrb[11].mxu1 }
 0x2fa   : > { %1493 = vmatprep.mubr.msk.f32.mxu0 %vm1057_vm12, %v934_v52 }
 0x2fb   : > { %1230 = vmatmul.mubr.f32.gmra.mrb[16].mxu0 %v932_v51 }
 0x2fc   : > { %v1003_v11 = vpop.f32.mrb[12].mxu1 }
 0x2fd   : > { %v1005_v53 = vpop.f32.mrb[13].mxu1 }
 0x2fe   : > { %1494 = vmatprep.mubr.msk.f32.mxu1 %vm1057_vm12, %v1005_v53 }
 0x2ff   : > { %1328 = vmatmul.mubr.f32.vlgmr.msra.gmra.mrb[24].mxu1 %v1003_v11 }
 0x300   : > { %v1009_v1 = vpop.f32.mrb[14].mxu1 }
 0x301   : > { %v1011_v19 = vpop.f32.mrb[15].mxu1 }
 0x302   : > { %1495 = vmatprep.mubr.msk.f32.mxu1 %vm1057_vm12, %v1011_v19 }
 0x303   : > { %1333 = vmatmul.mubr.f32.gmra.mrb[26].mxu1 %v1009_v1 }
 0x304   : > { %v1015_v54 = vpop.f32.mrb[16].mxu1 }
 0x305   : > { %v1017_v55 = vpop.f32.mrb[17].mxu1 }
 0x306   : > { %1496 = vmatprep.mubr.msk.f32.mxu1 %vm1057_vm12, %v1017_v55 }
 0x307   : > { %1338 = vmatmul.mubr.f32.gmra.mrb[28].mxu1 %v1015_v54 }
 0x320   : > { %v1132_v29 = vpop.f32.mrb[18].mxu1 }
 0x321   : > { %v1134_v56 = vpop.f32.mrb[19].mxu1 }
 0x324   : > { %v1137_v57 = vpop.f32.mrb[20].mxu1 }
 0x325   : > { %v1139_v37 = vpop.f32.mrb[21].mxu1 }
 0x328   : > { %v1142_v58 = vpop.f32.mrb[22].mxu1 }
 0x329   : > { %v1144_v21 = vpop.f32.mrb[23].mxu1 }
 0x3c6   : > { %v1221_v59 = vpop.f32.mrb[12].mxu0 }
 0x3c7   : > { %v1222_v60 = vadd.f32 %v1221_v59, %v1132_v29  ;;  %v1223_v30 = vpop.f32.mrb[13].mxu0 }
 0x3ca   : > { %v1226_v61 = vpop.f32.mrb[14].mxu0 }
 0x3cb   : > { %v1227_v2 = vadd.f32 %v1226_v61, %v1137_v57  ;;  %v1228_v62 = vpop.f32.mrb[15].mxu0 }
 0x3ce   : > { %v1231_v63 = vpop.f32.mrb[16].mxu0 }
 0x3cf   : > { %v1232_v0 = vadd.f32 %v1231_v63, %v1142_v58  ;;  %v1233_v38 = vpop.f32.mrb[17].mxu0 }
 0x3d2   : > { %v1329_v4 = vpop.f32.mrb[24].mxu1 }
 0x3d3   : > { %v1343_v6 = vadd.f32 %v1329_v4, %v1222_v60  ;;  %v1331_v7 = vpop.f32.mrb[25].mxu1 }
 0x3d5   : > { %v1353_v8 = vadd.f32 %v1497_v5, %v1343_v6 }
 0x3d6   : > { %v1334_v10 = vpop.f32.mrb[26].mxu1 }
 0x3d7   : > { %v1356_v12 = vmax.f32 %v1353_v8, 0.0  ;;  %v1344_v13 = vadd.f32 %v1334_v10, %v1227_v2  ;;  %v1336_v9 = vpop.f32.mrb[27].mxu1 }
 0x3d9   : > { %1359 = vst [vmem:[%s254_s12] sm:$0xff] %v1356_v12  ;;  %v1354_v14 = vadd.f32 %v1497_v5, %v1344_v13 }
 0x3da   : > { %v1339_v15 = vpop.f32.mrb[28].mxu1 }
 0x3db   : > { %v1357_v17 = vmax.f32 %v1354_v14, 0.0  ;;  %v1345_v18 = vadd.f32 %v1339_v15, %v1232_v0  ;;  %v1341_v20 = vpop.f32.mrb[29].mxu1 }
 0x3dd   : > { %1360 = vst [vmem:[%s254_s12 + $0x8] sm:$0xff] %v1357_v17  ;;  %v1355_v22 = vadd.f32 %v1497_v5, %v1345_v18 }
 0x3df   : > { %v1358_v23 = vmax.f32 %v1355_v22, 0.0 }
 0x3e1   : > { %1361 = vst [vmem:[%s254_s12 + $0x10] sm:$0x3] %v1358_v23 }
 0x3e2 PF: > { %s17_s18 = sadd.s32 1, %s1804_s18  }
 0x3e3   : > { %p14_p5 = scmp.ge.s32.totalorder %s17_s18, 4  }
 0x3e5   :  { %16 = sbr.rel (!%p14_p5) target bundleno = 2 (0x2), region = 83 }
 0x3ec   :  { %1383 = vsyncpa [#allocation3], 1 }
 0x3ed   :  { %1385 = vsyncpa [#allocation3 + $0x1], 1 }
 0x3ee   :  { %1386 = vsyncpa [#allocation5], 1 }

</bundles_post_ra>
